<compile_context>
chip_gen: v5e
topology: v5e:2x2
jax: 0.10.0
libtpu: 0.0.40
codegen_flags: <defaults>
</compile_context>

<pallas_src>
import math

import numpy as np
import jax
import jax.numpy as jnp
from jax.experimental import pallas as pl
from jax.experimental.pallas import tpu as pltpu


def _round_up(x: int, m: int) -> int:
    return (x + m - 1) // m * m


def _kernel_broadcast(t_ref, ff_ref, ph_ref, o_ref):
    # t_ref : (blk, 1)   f32 timesteps for this batch tile
    # ff_ref: (1, dim)   f32 resident constant [freqs, freqs]
    # ph_ref: (1, dim)   f32 resident constant [0,...,0, pi/2,...,pi/2]
    # o_ref : (blk, dim) output tile  (single full-width store; cos == sin(x + pi/2))
    emb = t_ref[...] * ff_ref[...] + ph_ref[...]
    o_ref[...] = jnp.sin(emb).astype(o_ref.dtype)


def _kernel_folded(t_ref, e_ref, ff_ref, ph_ref, o_ref):
    # t_ref : (blk, r)       f32 timesteps, r consecutive rows folded into the lane axis
    # e_ref : (r, r*dim)     f32 resident one-hot expand: E[i, j] = (j // dim == i)
    # ff_ref: (1, r*dim)     f32 resident tiled [freqs, freqs]
    # ph_ref: (1, r*dim)     f32 resident tiled phase
    # o_ref : (blk, r*dim)   lane-dense output tile
    # MXU (idle otherwise) does the per-lane timestep broadcast: t_expand[b, j] = t[b, j//dim]
    t_expand = jnp.dot(t_ref[...], e_ref[...], preferred_element_type=jnp.float32)
    o_ref[...] = jnp.sin(t_expand * ff_ref[...] + ph_ref[...]).astype(o_ref.dtype)


def sinusoidal_position_embeddings(time: jax.Array, dim: int, *,
                                   block_b: int = 2048,
                                   out_dtype=jnp.float32) -> jax.Array:
    """time: (B,) -> (B, dim) embeddings, matching the PyTorch module (cos via phase-fold)."""
    assert dim % 2 == 0 and dim >= 4, "dim must be even and >= 4"
    b = time.shape[0]
    half_dim = dim // 2

    # Host-precomputed constants (DMA'd once, stay resident via constant index_map).
    scale = math.log(10000.0) / (half_dim - 1)
    freqs = np.exp(np.arange(half_dim, dtype=np.float32) * (-scale))
    ff_np = np.concatenate([freqs, freqs]).astype(np.float32)                       # (dim,)
    ph_np = np.concatenate([np.zeros(half_dim, np.float32),
                            np.full(half_dim, np.pi / 2, np.float32)])              # (dim,)

    # Fold r consecutive batch rows into the lane axis when dim < 128 so stores are
    # 128-lane dense.  (B, dim) and (B/r, r*dim) share the same row-major layout.
    r = 1
    if dim < 128 and 128 % dim == 0 and b % (128 // dim) == 0:
        r = 128 // dim
    rows = b // r
    fold_dim = r * dim

    ff = jnp.asarray(np.tile(ff_np, r)).reshape(1, fold_dim)
    ph = jnp.asarray(np.tile(ph_np, r)).reshape(1, fold_dim)
    t2d = time.astype(jnp.float32).reshape(rows, r)

    # Row-block choice: >= 2 grid steps when there is enough work (lets the "parallel"
    # axis shard across both v7x TensorCores), capped by block_b and a conservative
    # VMEM budget for the double-buffered output tile (safe for v5e's 16 MiB default).
    if rows >= 16:
        blk = min(block_b, _round_up(pl.cdiv(rows, 2), 8))
        vmem_rows = max(8, (((12 << 20) // (2 * fold_dim * 4)) // 8) * 8)
        blk = min(blk, vmem_rows)
    else:
        blk = rows  # full-extent block (valid even when rows % 8 != 0)
    grid = (pl.cdiv(rows, blk),)  # ragged boundary block handled by Pallas masking

    common = dict(
        out_shape=jax.ShapeDtypeStruct((rows, fold_dim), out_dtype),
        grid=grid,
        out_specs=pl.BlockSpec((blk, fold_dim), lambda i: (i, 0)),
        compiler_params=pltpu.CompilerParams(dimension_semantics=("parallel",)),
    )

    if r == 1:
        out = pl.pallas_call(
            _kernel_broadcast,
            in_specs=[
                pl.BlockSpec((blk, 1), lambda i: (i, 0)),          # batch tile of timesteps
                pl.BlockSpec((1, fold_dim), lambda i: (0, 0)),     # resident freqs
                pl.BlockSpec((1, fold_dim), lambda i: (0, 0)),     # resident phase
            ],
            **common,
        )(t2d, ff, ph)
    else:
        expand = jnp.asarray(
            np.kron(np.eye(r, dtype=np.float32), np.ones((1, dim), np.float32))
        )  # (r, r*dim) one-hot expand matrix
        out = pl.pallas_call(
            _kernel_folded,
            in_specs=[
                pl.BlockSpec((blk, r), lambda i: (i, 0)),          # folded timestep tile
                pl.BlockSpec((r, fold_dim), lambda i: (0, 0)),     # resident expand matrix
                pl.BlockSpec((1, fold_dim), lambda i: (0, 0)),     # resident freqs
                pl.BlockSpec((1, fold_dim), lambda i: (0, 0)),     # resident phase
            ],
            **common,
        )(t2d, expand, ff, ph)

    # Free row-major un-fold back to (B, dim).
    return out.reshape(b, dim)


def _reference(time: jax.Array, dim: int) -> jax.Array:
    half_dim = dim // 2
    emb = math.log(10000.0) / (half_dim - 1)
    freqs = jnp.exp(jnp.arange(half_dim, dtype=jnp.float32) * -emb)
    e = time[:, None] * freqs[None, :]
    return jnp.concatenate([jnp.sin(e), jnp.cos(e)], axis=-1)


if __name__ == "__main__":
    key = jax.random.PRNGKey(0)
    k0, k1 = jax.random.split(key)

    # Deterministic diffusion-style timesteps; exercises the lane-folded path (r = 4).
    B, DIM = 8, 32
    time = jax.random.uniform(k0, (B,), dtype=jnp.float32, minval=0.0, maxval=1000.0)
    out = jax.block_until_ready(sinusoidal_position_embeddings(time, DIM))
    ref = _reference(time, DIM)
    assert out.shape == (B, DIM), out.shape
    # cos(x) = sin(x + pi/2) phase-fold differs from exact cos by O(ulp(t * f_max)):
    # <= ~1e-4 absolute for timesteps up to 1000, hence the 3e-4 tolerance.
    err = float(jnp.max(jnp.abs(out - ref)))
    assert err < 3e-4, err

    # Second tiny config exercises the unfolded (dim >= 128) path.
    B2, DIM2 = 12, 128
    time2 = jax.random.uniform(k1, (B2,), dtype=jnp.float32, minval=0.0, maxval=1000.0)
    out2 = jax.block_until_ready(sinusoidal_position_embeddings(time2, DIM2))
    ref2 = _reference(time2, DIM2)
    assert out2.shape == (B2, DIM2), out2.shape
    err2 = float(jnp.max(jnp.abs(out2 - ref2)))
    assert err2 < 3e-4, err2

    print("KERNEL_OK")
</pallas_src>

<mosaic_0001>
module attributes {stable_mosaic.version = 11 : i64} {
  func.func @_kernel_folded(%arg0: i32, %arg1: memref<2x4xf32, #tpu.memory_space<vmem>>, %arg2: memref<4x128xf32, #tpu.memory_space<vmem>>, %arg3: memref<1x128xf32, #tpu.memory_space<vmem>>, %arg4: memref<1x128xf32, #tpu.memory_space<vmem>>, %arg5: memref<2x128xf32, #tpu.memory_space<vmem>>) attributes {dimension_semantics = [#tpu.dimension_semantics<parallel>], iteration_bounds = array<i64: 1>, scalar_prefetch = 0 : i64, scratch_operands = 0 : i64, tpu.core_type = #tpu.core_type<tc>, window_params = [{transform_indices = @transform_0, window_bounds = array<i64: 2, 4>}, {pipeline_mode = #tpu.pipeline_mode<synchronous>, transform_indices = @transform_1, window_bounds = array<i64: 4, 128>}, {pipeline_mode = #tpu.pipeline_mode<synchronous>, transform_indices = @transform_2, window_bounds = array<i64: 1, 128>}, {pipeline_mode = #tpu.pipeline_mode<synchronous>, transform_indices = @transform_3, window_bounds = array<i64: 1, 128>}, {transform_indices = @transform_4, window_bounds = array<i64: 2, 128>}]} {
    %c0 = arith.constant 0 : index
    %c0_0 = arith.constant 0 : index
    %0 = vector.load %arg1[%c0, %c0_0] : memref<2x4xf32, #tpu.memory_space<vmem>>, vector<2x4xf32>
    %c0_1 = arith.constant 0 : index
    %c0_2 = arith.constant 0 : index
    %1 = vector.load %arg2[%c0_1, %c0_2] : memref<4x128xf32, #tpu.memory_space<vmem>>, vector<4x128xf32>
    %cst = arith.constant dense<0.000000e+00> : vector<2x128xf32>
    %2 = tpu.matmul %0, %1, %cst {dimension_numbers = #tpu.dot_dimension_numbers<[1], [0], [0], [1], [0, 0, 1, 1], [], []>} : vector<2x4xf32>, vector<4x128xf32>, vector<2x128xf32> -> vector<2x128xf32>
    %c0_3 = arith.constant 0 : index
    %c0_4 = arith.constant 0 : index
    %3 = vector.load %arg3[%c0_3, %c0_4] : memref<1x128xf32, #tpu.memory_space<vmem>>, vector<1x128xf32>
    %4 = vector.broadcast %3 : vector<1x128xf32> to vector<2x128xf32>
    %5 = arith.mulf %2, %4 : vector<2x128xf32>
    %c0_5 = arith.constant 0 : index
    %c0_6 = arith.constant 0 : index
    %6 = vector.load %arg4[%c0_5, %c0_6] : memref<1x128xf32, #tpu.memory_space<vmem>>, vector<1x128xf32>
    %7 = vector.broadcast %6 : vector<1x128xf32> to vector<2x128xf32>
    %8 = arith.addf %5, %7 : vector<2x128xf32>
    %9 = math.sin %8 : vector<2x128xf32>
    %c0_7 = arith.constant 0 : index
    %c0_8 = arith.constant 0 : index
    %10 = vector.load %arg5[%c0_7, %c0_8] : memref<2x128xf32, #tpu.memory_space<vmem>>, vector<2x128xf32>
    tpu.vector_store %arg5[%c0_7, %c0_8], %9 {strides = array<i32>} : memref<2x128xf32, #tpu.memory_space<vmem>>, vector<2x128xf32>,
    return
  }
  func.func @transform_0(%arg0: i32) -> (i32, i32) {
    %c0_i32 = arith.constant 0 : i32
    %c0_i32_0 = arith.constant 0 : i32
    return %arg0, %c0_i32 : i32, i32
  }
  func.func @transform_1(%arg0: i32) -> (i32, i32) {
    %c0_i32 = arith.constant 0 : i32
    %c0_i32_0 = arith.constant 0 : i32
    %c0_i32_1 = arith.constant 0 : i32
    return %c0_i32, %c0_i32_0 : i32, i32
  }
  func.func @transform_2(%arg0: i32) -> (i32, i32) {
    %c0_i32 = arith.constant 0 : i32
    %c0_i32_0 = arith.constant 0 : i32
    %c0_i32_1 = arith.constant 0 : i32
    return %c0_i32, %c0_i32_0 : i32, i32
  }
  func.func @transform_3(%arg0: i32) -> (i32, i32) {
    %c0_i32 = arith.constant 0 : i32
    %c0_i32_0 = arith.constant 0 : i32
    %c0_i32_1 = arith.constant 0 : i32
    return %c0_i32, %c0_i32_0 : i32, i32
  }
  func.func @transform_4(%arg0: i32) -> (i32, i32) {
    %c0_i32 = arith.constant 0 : i32
    %c0_i32_0 = arith.constant 0 : i32
    return %arg0, %c0_i32 : i32, i32
  }
}

</mosaic_0001>

<bundles_post_ra>
// kernel: tpu_custom_call.1
= control target key start
LH: loop header
LB: loop body
LE: loop exit
PB: predicated region body
PF: predicated region fallthrough
CT: control target
= control target key end

     0   :  { %9 = vsyncpa [#allocation3], 0  ;;  %s461_s0 = inlined_call_operand.hbm [shape: f32[2,4], index: 0, kind: input, shape index: {}]   ;;  %s462_s1 = inlined_call_operand.hbm [shape: f32[4,128], index: 1, kind: input, shape index: {}]   ;;  %s463_s2 = inlined_call_operand.vmem [shape: f32[1,128], index: 2, kind: input, shape index: {}]   ;;  %s464_s3 = inlined_call_operand.vmem [shape: f32[1,128], index: 3, kind: input, shape index: {}]   ;;  %s465_s4 = inlined_call_operand.hbm [shape: f32[2,128], index: 4, kind: output, shape index: {}]  }
   0x1   :  { %10 = vsyncpa [#allocation6], 0 }
   0x2   :  { %11 = vsyncpa [#allocation4], 0  ;;  %s17_s17 = sshll.u32 %s461_s0, 4  ;;  %s355_s18 = smov [#allocation2]   ;;  %s18_s17 = int_to_ptr.hbm [resolvable:$true] %s17_s17 }
   0x3   :  { %s19_s19 = sshll.u32 %s355_s18, 4  ;;  %s28_s22 = sshll.u32 %s462_s1, 4  ;;  %s20_s19 = int_to_ptr.vmem [resolvable:$true] %s19_s19  ;;  %s29_s22 = int_to_ptr.hbm [resolvable:$true] %s28_s22 }
   0x4   :  { %22 = dma.hbm_to_vmem [thread:$0]  %s18_s17, 32, %s20_s19, [#allocation3]  }
   0x5   :  { %s356_s23 = smov [#allocation5]  }
   0x6   :  { %s30_s24 = sshll.u32 %s356_s23, 4  ;;  %s31_s24 = int_to_ptr.vmem [resolvable:$true] %s30_s24 }
   0x7   :  { %33 = dma.hbm_to_vmem [thread:$0]  %s29_s22, 64, %s31_s24, [#allocation6]  }
   0x8   :  { %349 = dma.done.wait [#allocation3], 32  }
   0x9   :  { %350 = vsyncadd [#allocation3], 4294967264 }
   0xa   :  { %351 = dma.done.wait [#allocation6], 64  }
   0xb   :  { %352 = vsyncadd [#allocation6], 4294967232  ;;  %vm52_vm0 = vcmask 1043456   ;;  %vm48_vm1 = vcmask 31744   ;;  %v47_v0 = vld [vmem:[#allocation5] sm:$0xf] }
   0xc   :  { %v46_v1 = vld [vmem:[#allocation2] sm:$0x3]  ;;  %260 = vmatpush.msk.msra.mxu0 %vm52_vm0, %v47_v0  ;;  %v357_v18 = vmov 683565275   ;;  %v358_v20 = vmov 2475754826  }
   0xd   :  { %261 = vmatmul.msk.f32.vlgmr.msra.gmra.mxu0 %vm48_vm1, %v46_v1  ;;  %v275_v2 = vld [vmem:[%s463_s2] ss:$0 sm:$0xff]  ;;  %v359_v23 = vmov 2131351028   ;;  %v360_v26 = vmov 2102212464  }
   0xe   :  { %v276_v3 = vld [vmem:[%s464_s3] ss:$0 sm:$0xff]  ;;  %v361_v29 = vmov 920167782   ;;  %v362_v32 = vmov 1326507024  }
   0xf   :  { %s364_s2 = smov [#allocation7]   ;;  %s249_s29 = sshll.u32 %s465_s4, 4  ;;  %s250_s29 = int_to_ptr.hbm [resolvable:$true] %s249_s29 }
  0x10   :  { %s247_s3 = sshll.u32 %s364_s2, 4  ;;  %s248_s3 = int_to_ptr.vmem [resolvable:$true] %s247_s3 }
  0x8a   :  { %v73_v4 = vpop.f32.mrf.mxu0 }
  0x8b   :  { %v80_v5 = vmul.f32 %v275_v2, %v73_v4 }
  0x8d   :  { %v402_v6 = vadd.f32 %v276_v3, %v80_v5  ;;  %v363_v5 = vmov 0  }
  0x8f   :  { %v89_v7 = vand.u32 2139095040, %v402_v6  ;;  %v86_v10 = vand.u32 2147483647, %v402_v6  ;;  %vm88_vm14 = vcmp.lt.s32.totalorder %v402_v6, 0 }
  0x91   :  { %v90_v8 = vshrl.u32 %v89_v7, 23  ;;  %v93_v12 = vand.u32 8388607, %v86_v10  ;;  %vm87_vm15 = vcmp.le.f32.partialorder %v86_v10, 0.7853982 }
  0x93   :  { %v262_v9 = vadd.s32 4294967169, %v90_v8  ;;  %v94_v16 = vor.u32 8388608, %v93_v12 }
  0x95   :  { %v96_v11 = vadd.s32 1, %v262_v9  ;;  %v419_v39 = vshll.u32 %v94_v16, 8 }
  0x97   :  { %vm97_vm2 = vcmp.gt.s32.totalorder %v96_v11, 0  ;;  %v135_v48 = vand.u32 65535, %v419_v39  ;;  %v136_v53 = vshrl.u32 %v419_v39, 16 }
  0x98   :  { %v98_v13 = vsel %vm97_vm2, %v96_v11, 0 }
  0x99   :  { %v100_v14 = vand.u32 31, %v98_v13  ;;  %v410_v17 = vshrl.u32 %v98_v13, 5 }
  0x9b   :  { %v408_v15 = vsub.s32 32, %v100_v14  ;;  %v103_v19 = vshll.u32 %v357_v18, %v100_v14  ;;  %v106_v21 = vshll.u32 %v358_v20, %v100_v14  ;;  %v109_v25 = vshll.u32 %v359_v23, %v100_v14 }
  0x9c   :  { %v112_v28 = vshll.u32 %v360_v26, %v100_v14  ;;  %v115_v31 = vshll.u32 %v361_v29, %v100_v14  ;;  %vm118_vm3 = vcmp.lt.s32.totalorder %v410_v17, 1  ;;  %vm121_vm4 = vcmp.lt.s32.totalorder %v410_v17, 4 }
  0x9d   :  { %v104_v22 = vshrl.u32 %v358_v20, %v408_v15  ;;  %v107_v24 = vshrl.u32 %v359_v23, %v408_v15  ;;  %v110_v27 = vshrl.u32 %v360_v26, %v408_v15  ;;  %v113_v30 = vshrl.u32 %v361_v29, %v408_v15 }
  0x9e   :  { %v116_v33 = vshrl.u32 %v362_v32, %v408_v15  ;;  %vm120_vm5 = vcmp.lt.s32.totalorder %v410_v17, 3  ;;  %vm119_vm6 = vcmp.lt.s32.totalorder %v410_v17, 2  ;;  %v102_v12 = vshrl.u32 %v357_v18, %v408_v15 }
  0x9f   :  { %v105_v34 = vor.u32 %v104_v22, %v103_v19  ;;  %v108_v35 = vor.u32 %v107_v24, %v106_v21  ;;  %v111_v36 = vor.u32 %v110_v27, %v109_v25  ;;  %v114_v37 = vor.u32 %v113_v30, %v112_v28 }
  0xa0   :  { %v117_v38 = vor.u32 %v116_v33, %v115_v31 }
  0xa1   :  { %v126_v40 = vsel %vm118_vm3, %v105_v34, %v108_v35  ;;  %v130_v41 = vsel %vm118_vm3, %v108_v35, %v111_v36  ;;  %v127_v42 = vsel %vm121_vm4, %v114_v37, 920167782  ;;  %v123_v4 = vsel %vm121_vm4, %v111_v36, 2102212464 }
  0xa2   :  { %v131_v43 = vsel %vm121_vm4, %v117_v38, 1326507024  ;;  %v128_v44 = vsel %vm120_vm5, %v111_v36, %v127_v42  ;;  %v122_v22 = vsel %vm118_vm3, %v102_v12, %v105_v34  ;;  %v124_v23 = vsel %vm120_vm5, %v108_v35, %v123_v4 }
  0xa3   :  { %v132_v45 = vsel %vm120_vm5, %v114_v37, %v131_v43  ;;  %v129_v46 = vsel %vm119_vm6, %v126_v40, %v128_v44  ;;  %v125_v28 = vsel %vm119_vm6, %v122_v22, %v124_v23  ;;  %vm229_vm3 = vweird.f32 %v402_v6 }
  0xa4   :  { %v133_v47 = vsel %vm119_vm6, %v130_v41, %v132_v45  ;;  %v159_v51 = vand.u32 65535, %v129_v46  ;;  %v160_v52 = vshrl.u32 %v129_v46, 16  ;;  %v179_v31 = vmul.u32 %v419_v39, %v125_v28 }
  0xa5   :  { %v137_v49 = vand.u32 65535, %v133_v47  ;;  %v138_v50 = vshrl.u32 %v133_v47, 16 }
  0xa6   :  { %v162_v55 = vmul.u32 %v160_v52, %v135_v48  ;;  %v163_v57 = vmul.u32 %v159_v51, %v136_v53  ;;  %v161_v60 = vmul.u32 %v159_v51, %v135_v48  ;;  %v164_v63 = vmul.u32 %v160_v52, %v136_v53 }
  0xa7   :  { %v140_v54 = vmul.u32 %v138_v50, %v135_v48  ;;  %v141_v56 = vmul.u32 %v137_v49, %v136_v53  ;;  %v139_v58 = vmul.u32 %v137_v49, %v135_v48  ;;  %v142_v62 = vmul.u32 %v138_v50, %v136_v53 }
  0xa8   :  { %v165_v61 = vshll.u32 %v162_v55, 16  ;;  %v167_v1 = vshll.u32 %v163_v57, 16  ;;  %v166_v20 = vshrl.u32 %v162_v55, 16  ;;  %v168_v26 = vshrl.u32 %v163_v57, 16 }
  0xa9   :  { %v143_v59 = vshll.u32 %v140_v54, 16  ;;  %v145_v0 = vshll.u32 %v141_v56, 16  ;;  %v144_v16 = vshrl.u32 %v140_v54, 16  ;;  %v146_v24 = vshrl.u32 %v141_v56, 16 }
  0xaa   :  { %vm169_vm8 = vc.u32 %v161_v60, %v165_v61  ;;  %v171_v3 = vadd.s32 %v165_v61, %v161_v60 }
  0xab   :  { %vm147_vm7 = vc.u32 %v139_v58, %v143_v59  ;;  %v149_v2 = vadd.s32 %v143_v59, %v139_v58  ;;  %v170_v8 = vsel %vm169_vm8, 1, %v363_v5 }
  0xac   :  { %v148_v7 = vsel %vm147_vm7, 1, %v363_v5  ;;  %v172_v11 = vadd.s32 %v170_v8, %v164_v63  ;;  %vm173_vm10 = vc.u32 %v171_v3, %v167_v1  ;;  %v175_v18 = vadd.s32 %v171_v3, %v167_v1 }
  0xad   :  { %v150_v9 = vadd.s32 %v148_v7, %v142_v62  ;;  %vm151_vm9 = vc.u32 %v149_v2, %v145_v0  ;;  %v174_v14 = vsel %vm173_vm10, 1, %v363_v5 }
  0xae   :  { %v152_v13 = vsel %vm151_vm9, 1, %v363_v5  ;;  %v176_v21 = vadd.s32 %v174_v14, %v172_v11 }
  0xaf   :  { %v154_v19 = vadd.s32 %v152_v13, %v150_v9 }
  0xb0   :  { %v177_v27 = vadd.s32 %v176_v21, %v166_v20 }
  0xb1   :  { %v155_v25 = vadd.s32 %v154_v19, %v144_v16 }
  0xb2   :  { %v178_v29 = vadd.s32 %v177_v27, %v168_v26 }
  0xb3   :  { %v156_v15 = vadd.s32 %v155_v25, %v146_v24 }
  0xb4   :  { %v182_v30 = vadd.s32 1, %v178_v29 }
  0xb5   :  { %vm181_vm11 = vc.u32 %v156_v15, %v175_v18  ;;  %v180_v43 = vadd.s32 %v175_v18, %v156_v15 }
  0xb6   :  { %v183_v32 = vsel %vm181_vm11, %v182_v30, %v178_v29 }
  0xb7   :  { %v184_v33 = vadd.s32 %v183_v32, %v179_v31 }
  0xb9   :  { %v185_v34 = vadd.s32 536870912, %v184_v33 }
  0xbb   :  { %v186_v36 = vshrl.u32 %v185_v34, 30 }
  0xbd   :  { %v187_v37 = vshll.u32 %v186_v36, 30  ;;  %v210_v56 = vsub.s32 4, %v186_v36 }
  0xbf   :  { %v188_v35 = vsub.s32 %v184_v33, %v187_v37  ;;  %v211_v61 = vsel %vm88_vm14, %v210_v56, %v186_v36 }
  0xc0   :  { %v213_v0 = vsel %vm87_vm15, 0, %v211_v61 }
  0xc1   :  { %vm189_vm12 = vcmp.lt.s32.totalorder %v188_v35, 0  ;;  %v190_v38 = vsub.s32 0, %v188_v35  ;;  %v230_v5 = vadd.s32 3, %v213_v0 }
  0xc3   :  { %v191_v40 = vsel %vm189_vm12, %v190_v38, %v188_v35  ;;  %v231_v11 = vand.u32 3, %v230_v5 }
  0xc4   :  { %v192_v41 = vclz %v191_v40 }
  0xc5   :  { %vm233_vm0 = vcmp.eq.s32.totalorder %v231_v11, 0  ;;  %vm236_vm1 = vcmp.eq.s32.totalorder %v231_v11, 2  ;;  %vm232_vm2 = vcmp.lt.s32.totalorder %v231_v11, 2 }
  0xc6   :  { %v263_v42 = vadd.s32 4294967294, %v192_v41 }
  0xc8   :  { %vm264_vm13 = vcmp.lt.s32.totalorder %v263_v42, 0 }
  0xc9   :  { %v195_v17 = vsel %vm264_vm13, 0, %v263_v42 }
  0xca   :  { %v196_v44 = vsub.s32 32, %v195_v17  ;;  %v200_v45 = vsub.s32 4294967266, %v195_v17  ;;  %v197_v46 = vshll.u32 %v188_v35, %v195_v17 }
  0xcc   :  { %v198_v47 = vshrl.u32 %v180_v43, %v196_v44  ;;  %v201_v48 = vadd.s32 127, %v200_v45 }
  0xce   :  { %v199_v39 = vor.u32 %v198_v47, %v197_v46  ;;  %v202_v49 = vshll.u32 %v201_v48, 23 }
  0xd0   :  { %v203_v50 = vor.u32 4788187, %v202_v49  ;;  %v206_v52 = vcvt.s32.f32 %v199_v39 }
  0xd2   :  { %v204_v51 = vand.u32 2147483647, %v203_v50 }
  0xd4   :  { %v207_v53 = vmul.f32 %v206_v52, %v204_v51 }
  0xd6   :  { %v208_v54 = vxor.u32 2147483648, %v207_v53 }
  0xd8   :  { %v209_v55 = vsel %vm88_vm14, %v208_v54, %v207_v53 }
  0xd9   :  { %v212_v57 = vsel %vm87_vm15, %v402_v6, %v209_v55 }
  0xda   :  { %v214_v58 = vmul.f32 %v212_v57, %v212_v57 }
  0xdc   :  { %v215_v59 = vmul.f32 -0.001358992, %v214_v58  ;;  %v222_v60 = vmul.f32 -0.00019511016, %v214_v58 }
  0xde   :  { %v216_v62 = vadd.f32 0.041655596, %v215_v59  ;;  %v223_v63 = vadd.f32 0.008332121, %v222_v60 }
  0xe0   :  { %v217_v1 = vmul.f32 %v216_v62, %v214_v58  ;;  %v224_v2 = vmul.f32 %v223_v63, %v214_v58 }
  0xe2   :  { %v218_v3 = vadd.f32 -0.4999988, %v217_v1  ;;  %v225_v4 = vadd.f32 -0.16666654, %v224_v2 }
  0xe4   :  { %v219_v7 = vmul.f32 %v218_v3, %v214_v58  ;;  %v226_v8 = vmul.f32 %v225_v4, %v214_v58 }
  0xe6   :  { %v220_v9 = vadd.f32 1.0, %v219_v7  ;;  %v227_v10 = vadd.f32 1.0, %v226_v8 }
  0xe8   :  { %v228_v12 = vmul.f32 %v227_v10, %v212_v57  ;;  %v237_v13 = vxor.u32 2147483648, %v220_v9 }
  0xea   :  { %v234_v14 = vxor.u32 2147483648, %v228_v12  ;;  %v238_v19 = vsel %vm236_vm1, %v237_v13, %v228_v12 }
  0xec   :  { %v235_v16 = vsel %vm233_vm0, %v220_v9, %v234_v14 }
  0xed   :  { %v239_v20 = vsel %vm232_vm2, %v235_v16, %v238_v19 }
  0xee   :  { %v240_v21 = vsel %vm229_vm3, nan, %v239_v20 }
  0xef   :  { %241 = vst [vmem:[#allocation7] sm:$0x3] %v240_v21 }
  0xf0   :  { %252 = dma.vmem_to_hbm [thread:$0]  %s248_s3, 32, %s250_s29, [#allocation4]  }
  0xf1   :  { %353 = dma.done.wait [#allocation4], 32  }
  0xf2   :  { %354 = vsyncadd [#allocation4], 4294967264 }
  0xf3   :  { %257 = vsyncpa [#allocation3], 1 }
  0xf4   :  { %258 = vsyncpa [#allocation6], 1 }
  0xf5   :  { %259 = vsyncpa [#allocation4], 1 }

</bundles_post_ra>
